<compile_context>
chip_gen: v6e
topology: v6e:2x2x1
jax: 0.10.0
libtpu: 0.0.40
codegen_flags: <defaults>
</compile_context>

<pallas_src>
import functools
import math

import jax
import jax.numpy as jnp
from jax.experimental import pallas as pl
from jax.experimental.pallas import tpu as pltpu

_INV_SQRT2 = 1.0 / math.sqrt(2.0)


def _round_up(a, b):
    return ((a + b - 1) // b) * b


def _vmem_capacity_bytes():
    # Resolved once at import time (not per call): per-TensorCore VMEM size.
    try:
        return int(pltpu.get_tpu_info().vmem_capacity_bytes)
    except Exception:
        return 64 << 20  # conservative fallback: v7x per-TC VMEM


_VMEM_CAP = _vmem_capacity_bytes()


def _mlp_kernel(x_ref, w1_ref, b1_ref, w2_ref, b2_ref, o_ref, acc_ref):
    # Grid: (row tiles, hidden chunks). x tile and output tile are resident
    # across the hidden ("arbitrary") axis; acc_ref is the f32 accumulator.
    j = pl.program_id(1)

    @pl.when(j == 0)
    def _():
        acc_ref[...] = jnp.zeros_like(acc_ref)

    # fc1 on this hidden chunk: bf16 MXU operands, f32 accumulation.
    h = jnp.dot(x_ref[...], w1_ref[...], preferred_element_type=jnp.float32)
    h = h + b1_ref[...]
    # Exact GELU (PyTorch nn.GELU default): 0.5*x*(1+erf(x/sqrt(2))), in f32.
    h = 0.5 * h * (1.0 + jax.lax.erf(h * _INV_SQRT2))
    # dropout(p=0.0) -> identity
    # fc2 partial product for this hidden chunk (bf16 operands, f32 acc).
    acc_ref[...] += jnp.dot(h.astype(w2_ref.dtype), w2_ref[...],
                            preferred_element_type=jnp.float32)

    @pl.when(j == pl.num_programs(1) - 1)
    def _():
        # dropout(p=0.0) -> identity; single fused bias add on finalize.
        o_ref[...] = (acc_ref[...] + b2_ref[...]).astype(o_ref.dtype)


def _vmem_limit_bytes(tm, d_in, th, d_out, out_bytes):
    x_b = 2 * tm * d_in * 2              # x tile, double-buffered, bf16
    w1_b = 2 * d_in * th * 2             # W1 slab, double-buffered, bf16
    w2_b = 2 * th * d_out * 2            # W2 slab, double-buffered, bf16
    b_b = 2 * 8 * (th + d_out) * 4       # biases (sublane-padded), f32
    o_b = 2 * tm * d_out * out_bytes     # output tile, double-buffered
    acc_b = tm * d_out * 4               # f32 accumulator scratch
    mid_b = tm * th * (4 + 2)            # fc1 intermediate (f32 + bf16 cast)
    est = x_b + w1_b + w2_b + b_b + o_b + acc_b + mid_b + (4 << 20)
    return int(min(max(est, 16 << 20), (_VMEM_CAP * 7) // 8))


def prepare_mlp_params(w1, b1, w2, b2, *, hidden_tile=512):
    """One-time pad + bf16 cast of the MLP weights (call at model init).

    w1: (D_in, H), b1: (H,), w2: (H, D_out), b2: (D_out,).
    Returns (padded_params, meta) for mlp_pallas.
    """
    d_in, h = w1.shape
    d_out = w2.shape[1]
    # Feature dims padded to multiples of 128 (lane-dense); typical ViT dims
    # (768/3072) are already 256-aligned for the 256-wide v6e/v7x MXU.
    d_in_p = _round_up(d_in, 128)
    th = min(hidden_tile, _round_up(h, 128))   # hidden chunk width
    h_p = _round_up(h, th)
    d_out_p = _round_up(d_out, 128)

    # Zero padding preserves the result: padded x cols meet zero W1 rows,
    # padded hidden cols give GELU(0)=0 and meet zero W2 rows, padded output
    # cols are sliced away in the wrapper.
    w1p = jnp.pad(w1, ((0, d_in_p - d_in), (0, h_p - h))).astype(jnp.bfloat16)
    w2p = jnp.pad(w2, ((0, h_p - h), (0, d_out_p - d_out))).astype(jnp.bfloat16)
    b1p = jnp.pad(b1, (0, h_p - h)).reshape(1, h_p).astype(jnp.float32)
    b2p = jnp.pad(b2, (0, d_out_p - d_out)).reshape(1, d_out_p).astype(jnp.float32)
    meta = dict(d_in=d_in, d_out=d_out, th=th)
    return (w1p, b1p, w2p, b2p), meta


@functools.partial(jax.jit, static_argnames=("d_in", "d_out", "th", "tm"))
def _mlp_forward(x, w1p, b1p, w2p, b2p, *, d_in, d_out, th, tm):
    lead_shape = x.shape[:-1]
    M = int(math.prod(lead_shape))
    d_in_p, h_p = w1p.shape
    d_out_p = w2p.shape[1]
    out_dtype = x.dtype

    # bf16 activations pack 16 sublanes per vreg -> round rows to 16.
    tm_eff = min(tm, _round_up(M, 16))
    m_pad = _round_up(M, tm_eff)

    x2d = x.reshape(M, d_in)
    x2d = jnp.pad(x2d, ((0, m_pad - M), (0, d_in_p - d_in))).astype(jnp.bfloat16)

    grid = (m_pad // tm_eff, h_p // th)
    out2d = pl.pallas_call(
        _mlp_kernel,
        out_shape=jax.ShapeDtypeStruct((m_pad, d_out_p), out_dtype),
        grid_spec=pltpu.PrefetchScalarGridSpec(
            num_scalar_prefetch=0,
            grid=grid,
            in_specs=[
                pl.BlockSpec((tm_eff, d_in_p), lambda i, j: (i, 0)),  # x tile
                pl.BlockSpec((d_in_p, th), lambda i, j: (0, j)),      # W1 slab
                pl.BlockSpec((1, th), lambda i, j: (0, j)),           # b1 slab
                pl.BlockSpec((th, d_out_p), lambda i, j: (j, 0)),     # W2 slab
                pl.BlockSpec((1, d_out_p), lambda i, j: (0, 0)),      # b2
            ],
            out_specs=pl.BlockSpec((tm_eff, d_out_p), lambda i, j: (i, 0)),
            scratch_shapes=[pltpu.VMEM((tm_eff, d_out_p), jnp.float32)],
        ),
        compiler_params=pltpu.CompilerParams(
            dimension_semantics=("parallel", "arbitrary"),
            vmem_limit_bytes=_vmem_limit_bytes(
                tm_eff, d_in_p, th, d_out_p, jnp.dtype(out_dtype).itemsize),
        ),
    )(x2d, w1p, b1p, w2p, b2p)

    return out2d[:M, :d_out].reshape(*lead_shape, d_out)


def mlp_pallas(x, params, meta, *, tm=512):
    """x: (..., D_in); params/meta from prepare_mlp_params."""
    w1p, b1p, w2p, b2p = params
    return _mlp_forward(x, w1p, b1p, w2p, b2p, tm=tm, **meta)


def mlp_reference(x, w1, b1, w2, b2):
    h = x @ w1 + b1
    h = 0.5 * h * (1.0 + jax.lax.erf(h / jnp.sqrt(2.0)))
    return h @ w2 + b2


if __name__ == "__main__":
    # Small shapes consistent with a ViT MLP block.
    B, N = 2, 8                   # batch, sequence length (tokens)
    D_in, H, D_out = 32, 64, 32   # in_features, hidden_features, out_features

    key = jax.random.PRNGKey(0)
    kx, kw1, kb1, kw2, kb2 = jax.random.split(key, 5)

    x = jax.random.normal(kx, (B, N, D_in), dtype=jnp.float32)

    # Deterministic init mimicking nn.Linear: U(-1/sqrt(fan_in), 1/sqrt(fan_in))
    lim1 = 1.0 / math.sqrt(D_in)
    w1 = jax.random.uniform(kw1, (D_in, H), minval=-lim1, maxval=lim1,
                            dtype=jnp.float32)
    b1 = jax.random.uniform(kb1, (H,), minval=-lim1, maxval=lim1,
                            dtype=jnp.float32)
    lim2 = 1.0 / math.sqrt(H)
    w2 = jax.random.uniform(kw2, (H, D_out), minval=-lim2, maxval=lim2,
                            dtype=jnp.float32)
    b2 = jax.random.uniform(kb2, (D_out,), minval=-lim2, maxval=lim2,
                            dtype=jnp.float32)

    # One-time weight preparation (pad + bf16 cast), as at model init.
    params, meta = prepare_mlp_params(w1, b1, w2, b2)

    out = mlp_pallas(x, params, meta)
    out = jax.block_until_ready(out)

    ref = mlp_reference(x, w1, b1, w2, b2)
    assert out.shape == (B, N, D_out)
    # bf16 MXU operands with f32 accumulation -> loosened tolerance vs f32 ref.
    assert jnp.allclose(out, ref, atol=5e-2, rtol=5e-2), "mismatch vs reference"

    print("KERNEL_OK")
</pallas_src>

<mosaic_0001>
module attributes {stable_mosaic.version = 11 : i64} {
  func.func @_mlp_kernel(%arg0: i32, %arg1: i32, %arg2: memref<16x128xbf16, #tpu.memory_space<vmem>>, %arg3: memref<128x128xbf16, #tpu.memory_space<vmem>>, %arg4: memref<1x128xf32, #tpu.memory_space<vmem>>, %arg5: memref<128x128xbf16, #tpu.memory_space<vmem>>, %arg6: memref<1x128xf32, #tpu.memory_space<vmem>>, %arg7: memref<16x128xf32, #tpu.memory_space<vmem>>, %arg8: memref<16x128xf32, #tpu.memory_space<vmem>>) attributes {dimension_semantics = [#tpu.dimension_semantics<parallel>, #tpu.dimension_semantics<arbitrary>], iteration_bounds = array<i64: 1, 1>, scalar_prefetch = 0 : i64, scratch_operands = 1 : i64, tpu.core_type = #tpu.core_type<tc>, window_params = [{transform_indices = @transform_0, window_bounds = array<i64: 16, 128>}, {transform_indices = @transform_1, window_bounds = array<i64: 128, 128>}, {transform_indices = @transform_2, window_bounds = array<i64: 1, 128>}, {transform_indices = @transform_3, window_bounds = array<i64: 128, 128>}, {pipeline_mode = #tpu.pipeline_mode<synchronous>, transform_indices = @transform_4, window_bounds = array<i64: 1, 128>}, {transform_indices = @transform_5, window_bounds = array<i64: 16, 128>}]} {
    %c0_i32 = arith.constant 0 : i32
    %0 = arith.cmpi eq, %arg1, %c0_i32 : i32
    %1 = arith.extui %0 : i1 to i32
    %c0_i32_0 = arith.constant 0 : i32
    %2 = arith.cmpi ne, %1, %c0_i32_0 : i32
    scf.if %2 {
      %cst_18 = arith.constant 0.000000e+00 : f32
      %26 = vector.broadcast %cst_18 : f32 to vector<16x128xf32>
      %c0_19 = arith.constant 0 : index
      %c0_20 = arith.constant 0 : index
      %27 = vector.load %arg8[%c0_19, %c0_20] : memref<16x128xf32, #tpu.memory_space<vmem>>, vector<16x128xf32>
      tpu.vector_store %arg8[%c0_19, %c0_20], %26 {strides = array<i32>} : memref<16x128xf32, #tpu.memory_space<vmem>>, vector<16x128xf32>,
    } else {
    }
    %c0 = arith.constant 0 : index
    %c0_1 = arith.constant 0 : index
    %3 = vector.load %arg2[%c0, %c0_1] : memref<16x128xbf16, #tpu.memory_space<vmem>>, vector<16x128xbf16>
    %c0_2 = arith.constant 0 : index
    %c0_3 = arith.constant 0 : index
    %4 = vector.load %arg3[%c0_2, %c0_3] : memref<128x128xbf16, #tpu.memory_space<vmem>>, vector<128x128xbf16>
    %cst = arith.constant dense<0.000000e+00> : vector<16x128xf32>
    %5 = tpu.matmul %3, %4, %cst {dimension_numbers = #tpu.dot_dimension_numbers<[1], [0], [0], [1], [0, 0, 1, 1], [], []>} : vector<16x128xbf16>, vector<128x128xbf16>, vector<16x128xf32> -> vector<16x128xf32>
    %c0_4 = arith.constant 0 : index
    %c0_5 = arith.constant 0 : index
    %6 = vector.load %arg4[%c0_4, %c0_5] : memref<1x128xf32, #tpu.memory_space<vmem>>, vector<1x128xf32>
    %7 = vector.broadcast %6 : vector<1x128xf32> to vector<16x128xf32>
    %8 = arith.addf %5, %7 : vector<16x128xf32>
    %cst_6 = arith.constant 5.000000e-01 : f32
    %9 = vector.broadcast %cst_6 : f32 to vector<16x128xf32>
    %10 = arith.mulf %9, %8 : vector<16x128xf32>
    %cst_7 = arith.constant 0.707106769 : f32
    %11 = vector.broadcast %cst_7 : f32 to vector<16x128xf32>
    %12 = arith.mulf %8, %11 : vector<16x128xf32>
    %13 = math.erf %12 : vector<16x128xf32>
    %cst_8 = arith.constant 1.000000e+00 : f32
    %14 = vector.broadcast %cst_8 : f32 to vector<16x128xf32>
    %15 = arith.addf %14, %13 : vector<16x128xf32>
    %16 = arith.mulf %10, %15 : vector<16x128xf32>
    %c0_9 = arith.constant 0 : index
    %c0_10 = arith.constant 0 : index
    %17 = vector.load %arg8[%c0_9, %c0_10] : memref<16x128xf32, #tpu.memory_space<vmem>>, vector<16x128xf32>
    %18 = arith.truncf %16 : vector<16x128xf32> to vector<16x128xbf16>
    %c0_11 = arith.constant 0 : index
    %c0_12 = arith.constant 0 : index
    %19 = vector.load %arg5[%c0_11, %c0_12] : memref<128x128xbf16, #tpu.memory_space<vmem>>, vector<128x128xbf16>
    %cst_13 = arith.constant dense<0.000000e+00> : vector<16x128xf32>
    %20 = tpu.matmul %18, %19, %cst_13 {dimension_numbers = #tpu.dot_dimension_numbers<[1], [0], [0], [1], [0, 0, 1, 1], [], []>} : vector<16x128xbf16>, vector<128x128xbf16>, vector<16x128xf32> -> vector<16x128xf32>
    %21 = arith.addf %17, %20 : vector<16x128xf32>
    %c0_14 = arith.constant 0 : index
    %c0_15 = arith.constant 0 : index
    %22 = vector.load %arg8[%c0_14, %c0_15] : memref<16x128xf32, #tpu.memory_space<vmem>>, vector<16x128xf32>
    tpu.vector_store %arg8[%c0_14, %c0_15], %21 {strides = array<i32>} : memref<16x128xf32, #tpu.memory_space<vmem>>, vector<16x128xf32>,
    %c0_i32_16 = arith.constant 0 : i32
    %23 = arith.cmpi eq, %arg1, %c0_i32_16 : i32
    %24 = arith.extui %23 : i1 to i32
    %c0_i32_17 = arith.constant 0 : i32
    %25 = arith.cmpi ne, %24, %c0_i32_17 : i32
    scf.if %25 {
      %c0_18 = arith.constant 0 : index
      %c0_19 = arith.constant 0 : index
      %26 = vector.load %arg8[%c0_18, %c0_19] : memref<16x128xf32, #tpu.memory_space<vmem>>, vector<16x128xf32>
      %c0_20 = arith.constant 0 : index
      %c0_21 = arith.constant 0 : index
      %27 = vector.load %arg6[%c0_20, %c0_21] : memref<1x128xf32, #tpu.memory_space<vmem>>, vector<1x128xf32>
      %28 = vector.broadcast %27 : vector<1x128xf32> to vector<16x128xf32>
      %29 = arith.addf %26, %28 : vector<16x128xf32>
      %c0_22 = arith.constant 0 : index
      %c0_23 = arith.constant 0 : index
      %30 = vector.load %arg7[%c0_22, %c0_23] : memref<16x128xf32, #tpu.memory_space<vmem>>, vector<16x128xf32>
      tpu.vector_store %arg7[%c0_22, %c0_23], %29 {strides = array<i32>} : memref<16x128xf32, #tpu.memory_space<vmem>>, vector<16x128xf32>,
    } else {
    }
    return
  }
  func.func @transform_0(%arg0: i32, %arg1: i32) -> (i32, i32) {
    %c0_i32 = arith.constant 0 : i32
    %c0_i32_0 = arith.constant 0 : i32
    return %arg0, %c0_i32 : i32, i32
  }
  func.func @transform_1(%arg0: i32, %arg1: i32) -> (i32, i32) {
    %c0_i32 = arith.constant 0 : i32
    %c0_i32_0 = arith.constant 0 : i32
    return %c0_i32, %arg1 : i32, i32
  }
  func.func @transform_2(%arg0: i32, %arg1: i32) -> (i32, i32) {
    %c0_i32 = arith.constant 0 : i32
    %c0_i32_0 = arith.constant 0 : i32
    return %c0_i32, %arg1 : i32, i32
  }
  func.func @transform_3(%arg0: i32, %arg1: i32) -> (i32, i32) {
    %c0_i32 = arith.constant 0 : i32
    %c0_i32_0 = arith.constant 0 : i32
    return %arg1, %c0_i32 : i32, i32
  }
  func.func @transform_4(%arg0: i32, %arg1: i32) -> (i32, i32) {
    %c0_i32 = arith.constant 0 : i32
    %c0_i32_0 = arith.constant 0 : i32
    %c0_i32_1 = arith.constant 0 : i32
    return %c0_i32, %c0_i32_0 : i32, i32
  }
  func.func @transform_5(%arg0: i32, %arg1: i32) -> (i32, i32) {
    %c0_i32 = arith.constant 0 : i32
    %c0_i32_0 = arith.constant 0 : i32
    return %arg0, %c0_i32 : i32, i32
  }
}

</mosaic_0001>

<bundles_post_ra>
// kernel: _mlp_forward.1
= control target key start
LH: loop header
LB: loop body
LE: loop exit
PB: predicated region body
PF: predicated region fallthrough
CT: control target
= control target key end

     0   :  { %10 = vsyncpa [#allocation4], 0  ;;  %s524_s0 = inlined_call_operand.vmem [shape: bf16[16,128], index: 0, kind: input, shape index: {}]   ;;  %s525_s1 = inlined_call_operand.hbm [shape: bf16[128,128], index: 1, kind: input, shape index: {}]   ;;  %s526_s2 = inlined_call_operand.vmem [shape: f32[1,128], index: 2, kind: input, shape index: {}]   ;;  %s527_s3 = inlined_call_operand.hbm [shape: bf16[128,128], index: 3, kind: input, shape index: {}]   ;;  %s528_s4 = inlined_call_operand.vmem [shape: f32[1,128], index: 4, kind: input, shape index: {}]   ;;  %s529_s5 = inlined_call_operand.vmem [shape: f32[16,128], index: 5, kind: output, shape index: {}]  }
   0x1   :  { %11 = vsyncpa [#allocation6], 0  ;;  %s467_s18 = smov [#allocation3]  }
   0x2   :  { %s19_s19 = sshll.u32 %s467_s18, 4  ;;  %s20_s19 = int_to_ptr.vmem [resolvable:$true] %s19_s19 }
   0x3   :  { %s431_s20 = scalar_lea.vmem %s20_s19, 1024  ;;  %p436_p1 = scmp.lt.s32.totalorder %s20_s19, %s20_s19 }
   0x4   :  { %p432_p0 = scmp.ne.s32.totalorder %s20_s19, %s431_s20  ;;  %p437_p2 = scmp.lt.s32.totalorder %s431_s20, %s431_s20 }
   0x6   :  { %p438_p3 = por %p437_p2, %p436_p1 }
   0x8   :  { %p439_p4 = pnand %p438_p3, %p432_p0 }
   0xa   :  { %442 = shalt.err (!%p439_p4)
}
   0xb   :  { %s468_s21 = smov 64   ;;  %s469_s22 = smov 4  }
   0xc   :  { %25 = dma.hbm_to_vmem [thread:$0]  %s525_s1, 1024, %s20_s19, [#allocation4], %s468_s21, %s468_s21, %s469_s22  }
   0xd   :  { %s470_s25 = smov [#allocation5]  }
   0xe   :  { %s33_s26 = sshll.u32 %s470_s25, 4  ;;  %s34_s26 = int_to_ptr.vmem [resolvable:$true] %s33_s26 }
   0xf   :  { %s451_s27 = scalar_lea.vmem %s34_s26, 1024  ;;  %p456_p6 = scmp.lt.s32.totalorder %s34_s26, %s34_s26 }
  0x10   :  { %p452_p5 = scmp.ne.s32.totalorder %s34_s26, %s451_s27  ;;  %p457_p7 = scmp.lt.s32.totalorder %s451_s27, %s451_s27 }
  0x12   :  { %p458_p8 = por %p457_p7, %p456_p6 }
  0x14   :  { %p459_p9 = pnand %p458_p8, %p452_p5 }
  0x16   :  { %462 = shalt.err (!%p459_p9)
}
  0x17   :  { %39 = dma.hbm_to_vmem [thread:$0]  %s527_s3, 1024, %s34_s26, [#allocation6], %s468_s21, %s468_s21, %s469_s22  }
  0x18   :  { %463 = dma.done.wait [#allocation4], 1024  }
  0x19   :  { %464 = vsyncadd [#allocation4], 4294966272 }
  0x1a   :  { %465 = dma.done.wait [#allocation6], 1024  }
  0x1b   :  { %466 = vsyncadd [#allocation6], 4294966272  ;;  %v471_v0 = vmov 0.0   ;;  %vm472_vm0 = vmmov 0   ;;  %v402_v1 = vld [vmem:[#allocation3 + $0x38] sm:$0xff]   ;;  %v403_v2 = vld [vmem:[#allocation3 + $0x30] sm:$0xff]  }
  0x1c   :  { %356 = vmatprep.subr.bf16.mxu0 %v471_v0  ;;  %372 = vmatprep.mubr.msk.bf16.mxu0 %vm472_vm0, %v471_v0  ;;  %v404_v3 = vld [vmem:[#allocation3 + $0x28] sm:$0xff]   ;;  %v411_v4 = vld [vmem:[#allocation5 + $0x38] sm:$0xff]   ;;  %v405_v5 = vld [vmem:[#allocation3 + $0x20] sm:$0xff]  }
  0x1d   :  { %376 = vmatprep.subr.bf16.mxu1 %v471_v0  ;;  %392 = vmatprep.mubr.msk.bf16.mxu1 %vm472_vm0, %v471_v0  ;;  %v406_v6 = vld [vmem:[#allocation3 + $0x18] sm:$0xff]   ;;  %v407_v7 = vld [vmem:[#allocation3 + $0x10] sm:$0xff]   ;;  %v408_v8 = vld [vmem:[#allocation3 + $0x8] sm:$0xff]  }
  0x1e   :  { %357 = vmatpush3.bf16.msra.mxu0 %v402_v1  ;;  %377 = vmatpush3.bf16.msra.mxu1 %v411_v4  ;;  %v409_v9 = vld [vmem:[#allocation3] sm:$0xff]   ;;  %v412_v11 = vld [vmem:[#allocation5 + $0x30] sm:$0xff]   ;;  %v413_v12 = vld [vmem:[#allocation5 + $0x28] sm:$0xff]  }
  0x1f   :  { %358 = vmatprep.subr.bf16.mxu0 %v471_v0  ;;  %378 = vmatprep.subr.bf16.mxu1 %v471_v0  ;;  %v410_v10 = vld [vmem:[%s524_s0] sm:$0xff]   ;;  %v415_v14 = vld [vmem:[#allocation5 + $0x18] sm:$0xff]   ;;  %v416_v15 = vld [vmem:[#allocation5 + $0x10] sm:$0xff]  }
  0x20   :  { %v414_v13 = vld [vmem:[#allocation5 + $0x20] sm:$0xff]   ;;  %v417_v16 = vld [vmem:[#allocation5 + $0x8] sm:$0xff]  }
  0x21   :  { %v418_v17 = vld [vmem:[#allocation5] sm:$0xff]  }
  0x22   :  { %359 = vmatpush3.bf16.msra.mxu0 %v403_v2  ;;  %379 = vmatpush3.bf16.msra.mxu1 %v412_v11  ;;  %v319_v18 = vld [vmem:[%s526_s2] ss:$0 sm:$0xff] }
  0x23   :  { %360 = vmatprep.subr.bf16.mxu0 %v471_v0  ;;  %380 = vmatprep.subr.bf16.mxu1 %v471_v0  ;;  %v337_v36 = vld [vmem:[%s528_s4] ss:$0 sm:$0xff] }
  0x26   :  { %361 = vmatpush3.bf16.msra.mxu0 %v404_v3  ;;  %381 = vmatpush3.bf16.msra.mxu1 %v413_v12 }
  0x27   :  { %362 = vmatprep.subr.bf16.mxu0 %v471_v0  ;;  %382 = vmatprep.subr.bf16.mxu1 %v471_v0 }
  0x2a   :  { %363 = vmatpush3.bf16.msra.mxu0 %v405_v5  ;;  %383 = vmatpush3.bf16.msra.mxu1 %v414_v13 }
  0x2b   :  { %364 = vmatprep.subr.bf16.mxu0 %v471_v0  ;;  %384 = vmatprep.subr.bf16.mxu1 %v471_v0 }
  0x2e   :  { %365 = vmatpush3.bf16.msra.mxu0 %v406_v6  ;;  %385 = vmatpush3.bf16.msra.mxu1 %v415_v14 }
  0x2f   :  { %366 = vmatprep.subr.bf16.mxu0 %v471_v0  ;;  %386 = vmatprep.subr.bf16.mxu1 %v471_v0 }
  0x32   :  { %367 = vmatpush3.bf16.msra.mxu0 %v407_v7  ;;  %387 = vmatpush3.bf16.msra.mxu1 %v416_v15 }
  0x33   :  { %368 = vmatprep.subr.bf16.mxu0 %v471_v0  ;;  %388 = vmatprep.subr.bf16.mxu1 %v471_v0 }
  0x36   :  { %369 = vmatpush3.bf16.msra.mxu0 %v408_v8  ;;  %389 = vmatpush3.bf16.msra.mxu1 %v417_v16 }
  0x37   :  { %370 = vmatprep.subr.bf16.mxu0 %v471_v0  ;;  %390 = vmatprep.subr.bf16.mxu1 %v471_v0 }
  0x3a   :  { %371 = vmatpush3.bf16.msra.mxu0 %v409_v9  ;;  %391 = vmatpush3.bf16.msra.mxu1 %v418_v17 }
  0x3d   :  { %373 = vmatmul.mubr.bf16.vlgmr.msra.gmra.mxu0 %v410_v10 }
  0xfd   :  { %v168_v19 = vpop.f32.mrf.mxu0 }
  0xfe   :  { %v169_v20 = vadd.f32 %v319_v18, %v168_v19 }
  0xff   :  { %v374_v21 = vpop.f32.mrf.mxu0 }
 0x100   :  { %v177_v22 = vmul.f32 0.70710677, %v169_v20  ;;  %v175_v30 = vmul.f32 0.5, %v169_v20 }
 0x101   :  { %v171_v23 = vpop.f32.mrf.mxu0 }
 0x102   :  { %419 = verf.f32 %v177_v22  ;;  %v172_v24 = vadd.f32 %v319_v18, %v171_v23 }
 0x103   :  { %v375_v25 = vpop.f32.mrf.mxu0 }
 0x104   :  { %v178_v26 = vmul.f32 0.70710677, %v172_v24  ;;  %v176_v31 = vmul.f32 0.5, %v172_v24 }
 0x106   :  { %421 = verf.f32 %v178_v26 }
 0x10f   :  { %v420_v27 = vpop.eup %419 }
 0x110   :  { %v181_v28 = vadd.f32 1.0, %v420_v27 }
 0x112   :  { %v183_v33 = vmul.f32 %v181_v28, %v175_v30 }
 0x113   :  { %v422_v29 = vpop.eup %421 }
 0x114   :  { %v182_v32 = vadd.f32 1.0, %v422_v29 }
 0x116   :  { %v184_v34 = vmul.f32 %v182_v32, %v176_v31 }
 0x118   :  { %v187_v35 = vpack.c.bf16 %v184_v34, %v183_v33 }
 0x11a   :  { %393 = vmatmul.mubr.bf16.vlgmr.msra.gmra.mxu1 %v187_v35 }
 0x1da   :  { %v286_v37 = vpop.f32.mrf.mxu1 }
 0x1db   :  { %v309_v38 = vadd.f32 %v337_v36, %v286_v37 }
 0x1dc   :  { %v394_v39 = vpop.f32.mrf.mxu1 }
 0x1dd   :  { %311 = vst [vmem:[%s529_s5] sm:$0xff] %v309_v38 }
 0x1de   :  { %v289_v40 = vpop.f32.mrf.mxu1 }
 0x1df   :  { %v310_v41 = vadd.f32 %v337_v36, %v289_v40 }
 0x1e0   :  { %v395_v42 = vpop.f32.mrf.mxu1 }
 0x1e1   :  { %312 = vst [vmem:[%s529_s5 + $0x8] sm:$0xff] %v310_v41 }
 0x1e2   :  { %317 = vsyncpa [#allocation4], 1 }
 0x1e3   :  { %318 = vsyncpa [#allocation6], 1 }

</bundles_post_ra>
